<compile_context>
chip_gen: v5e
topology: v5e:2x2
jax: 0.10.0
libtpu: 0.0.40
codegen_flags: <defaults>
</compile_context>

<pallas_src>
import functools

import jax
import jax.numpy as jnp
from jax.experimental import pallas as pl
from jax.experimental.pallas import tpu as pltpu


_MAX_BLOCK_BATCH = 8192        # 8192 rows x 16 feats x 4 B = 512 KiB / buffer
_NO_GRID_MAX_BATCH = 1024      # below this: single invocation, no grid
_VMEM_LIMIT_BYTES = 32 * 1024 * 1024   # explicit; safe on v5e / v6e / v7x


def _round_up(n, m):
    return ((n + m - 1) // m) * m


def _mlp_fused_kernel(*refs, num_layers: int):
    """Fused forward of the whole MLP on one batch tile.

    refs = (x_ref, w0_ref, b0_ref, w1_ref, b1_ref, ..., o_ref).
    A Sigmoid is applied after every Linear except the last (the canonical
    Sequential construction the PyTorch module wraps).
    """
    x_ref, o_ref = refs[0], refs[-1]
    param_refs = refs[1:-1]

    h = x_ref[...]
    for li in range(num_layers):
        w = param_refs[2 * li][...]
        b = param_refs[2 * li + 1][...]       # (1, out) f32 -> broadcasts over rows
        # MXU matmul with f32 accumulation regardless of input dtype.
        h = jnp.dot(h.astype(w.dtype), w, preferred_element_type=jnp.float32) + b
        if li < num_layers - 1:
            # Sigmoid: exp lands on the EUP; approx reciprocal lowers to the
            # EUP vrcp as well, keeping the VALU free.
            h = pl.reciprocal(1.0 + jnp.exp(-h), approx=True)
    o_ref[...] = h.astype(o_ref.dtype)


def _pick_batch_tile(batch):
    """Rows per grid step: as large as useful (<= _MAX_BLOCK_BATCH), multiple
    of 8, and always >= 2 tiles for large batches so megacore has work."""
    num_tiles = max(2, pl.cdiv(batch, _MAX_BLOCK_BATCH))
    return _round_up(pl.cdiv(batch, num_tiles), 8)


@functools.partial(jax.jit, static_argnames=("block_batch",))
def mlp_forward(x, params, block_batch=None):
    """Fused MLP forward.  x: (batch, in_f); params: tuple of (W, b) pairs."""
    batch, in_f = x.shape
    num_layers = len(params)
    out_f = params[-1][0].shape[1]

    # Flatten params: weights as-is (possibly bf16), biases as (1, out) f32.
    flat = []
    for w, b in params:
        flat.append(w)
        flat.append(b.reshape(1, -1).astype(jnp.float32))

    kernel = functools.partial(_mlp_fused_kernel, num_layers=num_layers)
    out_shape = jax.ShapeDtypeStruct((batch, out_f), x.dtype)

    if block_batch is None and batch <= _NO_GRID_MAX_BATCH:
        # Small batch: whole problem fits in one VMEM tile -> no grid, no
        # pipeline bookkeeping (everything VMEM-resident, single invocation).
        return pl.pallas_call(
            kernel,
            out_shape=out_shape,
            compiler_params=pltpu.CompilerParams(
                vmem_limit_bytes=_VMEM_LIMIT_BYTES),
        )(x, *flat)

    # Batch-tiled path: large tiles over the batch (double-buffered x/out
    # DMA), weights + biases resident via a constant index_map, "parallel"
    # axis so megacore (v7x) shards the batch tiles across TensorCores.
    tb = _pick_batch_tile(batch) if block_batch is None else int(block_batch)
    tb = min(_round_up(tb, 8), _round_up(batch, 8))
    num_tiles = pl.cdiv(batch, tb)

    in_specs = [pl.BlockSpec((tb, in_f), lambda i: (i, 0))]
    for w, b in params:
        in_specs.append(pl.BlockSpec(w.shape, lambda i: (0, 0)))
        in_specs.append(pl.BlockSpec((1, b.shape[0]), lambda i: (0, 0)))
    out_specs = pl.BlockSpec((tb, out_f), lambda i: (i, 0))

    return pl.pallas_call(
        kernel,
        out_shape=out_shape,
        grid=(num_tiles,),
        in_specs=in_specs,
        out_specs=out_specs,
        compiler_params=pltpu.CompilerParams(
            dimension_semantics=("parallel",),
            vmem_limit_bytes=_VMEM_LIMIT_BYTES),
    )(x, *flat)


class MLP:
    """JAX/Pallas analogue of the PyTorch MLP(Sequential(layers)) module.

    `layer_sizes` defines the Linear layers; a Sigmoid follows every Linear
    except the last.  Weights and x/out I/O use `compute_dtype` (bf16 by
    default: half the HBM traffic, 2x MXU rate on v6e/v7x); matmul
    accumulation and the sigmoid run in f32 inside the kernel, so the same
    kernel is legal on v5e.
    """

    def __init__(self, layer_sizes, key, compute_dtype=jnp.bfloat16):
        self.compute_dtype = compute_dtype
        params = []
        for fan_in, fan_out in zip(layer_sizes[:-1], layer_sizes[1:]):
            key, wk, bk = jax.random.split(key, 3)
            # Mirrors torch.nn.Linear's U(-1/sqrt(fan_in), 1/sqrt(fan_in)).
            bound = 1.0 / (fan_in ** 0.5)
            w = jax.random.uniform(
                wk, (fan_in, fan_out), jnp.float32, -bound, bound)
            b = jax.random.uniform(bk, (fan_out,), jnp.float32, -bound, bound)
            params.append((w, b))
        self.params_f32 = tuple(params)
        self.params = tuple((w.astype(compute_dtype), b) for w, b in params)

    def __call__(self, x, *, block_batch=None):
        return mlp_forward(x.astype(self.compute_dtype), self.params,
                           block_batch=block_batch)


def _reference_forward(x, params):
    h = x
    for li, (w, b) in enumerate(params):
        h = h @ w + b
        if li < len(params) - 1:
            h = jax.nn.sigmoid(h)
    return h


if __name__ == "__main__":
    key = jax.random.PRNGKey(0)
    key, xk = jax.random.split(key)

    batch, in_f, hidden, out_f = 8, 16, 32, 16
    x = jax.random.normal(xk, (batch, in_f), jnp.float32)

    mlp = MLP([in_f, hidden, out_f], key)           # bf16 perf path (default)
    ref = _reference_forward(x, mlp.params_f32)

    # 1) f32 path, tight-ish tolerance (only the approx-reciprocal sigmoid
    #    differs from the exact reference).
    y32 = mlp_forward(x, mlp.params_f32)
    jax.block_until_ready(y32)
    assert y32.shape == (batch, out_f)
    assert jnp.allclose(y32, ref, atol=2e-2, rtol=2e-2)

    # 2) Default bf16 path, small batch -> no-grid (single VMEM invocation).
    y = mlp(x)
    jax.block_until_ready(y)
    assert y.shape == (batch, out_f) and y.dtype == jnp.bfloat16
    assert jnp.allclose(y.astype(jnp.float32), ref, atol=6e-2, rtol=6e-2)

    # 3) Batch-tiled "parallel" grid path with auto-derived large tiles
    #    (>= 2 tiles so v7x megacore gets both TensorCores busy).
    key, xk2 = jax.random.split(key)
    big = 4096
    xb = jax.random.normal(xk2, (big, in_f), jnp.float32)
    yb = mlp(xb)
    jax.block_until_ready(yb)
    refb = _reference_forward(xb, mlp.params_f32)
    assert yb.shape == (big, out_f)
    assert jnp.allclose(yb.astype(jnp.float32), refb, atol=6e-2, rtol=6e-2)

    # 4) Explicit block_batch to exercise a ragged tail tile (batch not a
    #    multiple of the tile); padded rows are computed but never written.
    key, xk3 = jax.random.split(key)
    xc = jax.random.normal(xk3, (300, in_f), jnp.float32)
    yc = mlp(xc, block_batch=128)
    jax.block_until_ready(yc)
    refc = _reference_forward(xc, mlp.params_f32)
    assert yc.shape == (300, out_f)
    assert jnp.allclose(yc.astype(jnp.float32), refc, atol=6e-2, rtol=6e-2)

    print("KERNEL_OK")
</pallas_src>

<mosaic_0001>
module attributes {stable_mosaic.version = 11 : i64} {
  func.func @_mlp_fused_kernel(%arg0: memref<8x16xf32, #tpu.memory_space<vmem>>, %arg1: memref<16x32xf32, #tpu.memory_space<vmem>>, %arg2: memref<1x32xf32, #tpu.memory_space<vmem>>, %arg3: memref<32x16xf32, #tpu.memory_space<vmem>>, %arg4: memref<1x16xf32, #tpu.memory_space<vmem>>, %arg5: memref<8x16xf32, #tpu.memory_space<vmem>>) attributes {dimension_semantics = [], scalar_prefetch = 0 : i64, scratch_operands = 0 : i64, tpu.core_type = #tpu.core_type<tc>} {
    %c0 = arith.constant 0 : index
    %c0_0 = arith.constant 0 : index
    %0 = vector.load %arg0[%c0, %c0_0] : memref<8x16xf32, #tpu.memory_space<vmem>>, vector<8x16xf32>
    %c0_1 = arith.constant 0 : index
    %c0_2 = arith.constant 0 : index
    %1 = vector.load %arg1[%c0_1, %c0_2] : memref<16x32xf32, #tpu.memory_space<vmem>>, vector<16x32xf32>
    %c0_3 = arith.constant 0 : index
    %c0_4 = arith.constant 0 : index
    %2 = vector.load %arg2[%c0_3, %c0_4] : memref<1x32xf32, #tpu.memory_space<vmem>>, vector<1x32xf32>
    %cst = arith.constant dense<0.000000e+00> : vector<8x32xf32>
    %3 = tpu.matmul %0, %1, %cst {dimension_numbers = #tpu.dot_dimension_numbers<[1], [0], [0], [1], [0, 0, 1, 1], [], []>} : vector<8x16xf32>, vector<16x32xf32>, vector<8x32xf32> -> vector<8x32xf32>
    %4 = vector.broadcast %2 : vector<1x32xf32> to vector<8x32xf32>
    %5 = arith.addf %3, %4 : vector<8x32xf32>
    %cst_5 = arith.constant 0.000000e+00 : f32
    %6 = vector.broadcast %cst_5 : f32 to vector<8x32xf32>
    %7 = arith.subf %6, %5 : vector<8x32xf32>
    %8 = math.exp %7 : vector<8x32xf32>
    %cst_6 = arith.constant 1.000000e+00 : f32
    %9 = vector.broadcast %cst_6 : f32 to vector<8x32xf32>
    %10 = arith.addf %9, %8 : vector<8x32xf32>
    %11 = tpu.reciprocal %10 {approx = true} : vector<8x32xf32> -> vector<8x32xf32>
    %c0_7 = arith.constant 0 : index
    %c0_8 = arith.constant 0 : index
    %12 = vector.load %arg3[%c0_7, %c0_8] : memref<32x16xf32, #tpu.memory_space<vmem>>, vector<32x16xf32>
    %c0_9 = arith.constant 0 : index
    %c0_10 = arith.constant 0 : index
    %13 = vector.load %arg4[%c0_9, %c0_10] : memref<1x16xf32, #tpu.memory_space<vmem>>, vector<1x16xf32>
    %cst_11 = arith.constant dense<0.000000e+00> : vector<8x16xf32>
    %14 = tpu.matmul %11, %12, %cst_11 {dimension_numbers = #tpu.dot_dimension_numbers<[1], [0], [0], [1], [0, 0, 1, 1], [], []>} : vector<8x32xf32>, vector<32x16xf32>, vector<8x16xf32> -> vector<8x16xf32>
    %15 = vector.broadcast %13 : vector<1x16xf32> to vector<8x16xf32>
    %16 = arith.addf %14, %15 : vector<8x16xf32>
    %c0_12 = arith.constant 0 : index
    %c0_13 = arith.constant 0 : index
    %17 = vector.load %arg5[%c0_12, %c0_13] : memref<8x16xf32, #tpu.memory_space<vmem>>, vector<8x16xf32>
    tpu.vector_store %arg5[%c0_12, %c0_13], %16 {strides = array<i32>} : memref<8x16xf32, #tpu.memory_space<vmem>>, vector<8x16xf32>,
    return
  }
}

</mosaic_0001>

<bundles_post_ra>
// kernel: mlp_forward.1
= control target key start
LH: loop header
LB: loop body
LE: loop exit
PB: predicated region body
PF: predicated region fallthrough
CT: control target
= control target key end

     0   :  { %vm28_vm0 = vcmask 130048   ;;  %s204_s0 = inlined_call_operand.vmem [shape: f32[8,16], index: 0, kind: input, shape index: {}]   ;;  %s205_s1 = inlined_call_operand.vmem [shape: f32[16,32], index: 1, kind: input, shape index: {}]   ;;  %s206_s2 = inlined_call_operand.vmem [shape: f32[1,32], index: 2, kind: input, shape index: {}]   ;;  %s207_s3 = inlined_call_operand.vmem [shape: f32[32,16], index: 3, kind: input, shape index: {}]   ;;  %s208_s4 = inlined_call_operand.vmem [shape: f32[1,16], index: 4, kind: input, shape index: {}]   ;;  %s209_s5 = inlined_call_operand.hbm [shape: f32[8,16], index: 5, kind: output, shape index: {}]  }
   0x1   :  { %v23_v0 = vld [vmem:[%s205_s1 + $0x8] sm:$0xff]  ;;  %v22_v1 = vld [vmem:[%s205_s1] sm:$0xff] }
   0x2   :  { %46 = vmatpush.msra.mxu0 %v23_v0  ;;  %v21_v2 = vld [vmem:[%s204_s0] sm:$0xff] }
   0x3   :  { %10 = vsyncpa [#allocation3], 0  ;;  %v60_v3 = vld [vmem:[%s207_s3 + $0x18] sm:$0xff]  ;;  %v59_v4 = vld [vmem:[%s207_s3 + $0x10] sm:$0xff]  ;;  %vm65_vm1 = vcmask 261120  }
   0x4   :  { %47 = vmatpush.msra.mxu0 %v22_v1  ;;  %81 = vmatpush.msra.mxu1 %v60_v3  ;;  %v58_v5 = vld [vmem:[%s207_s3 + $0x8] sm:$0xff]  ;;  %v57_v6 = vld [vmem:[%s207_s3] sm:$0xff]  ;;  %s141_s3 = smov [#allocation2]  }
   0x5   :  { %106 = vmatmul.msk.f32.vlgmr.msra.gmra.mxu0 %vm28_vm0, %v21_v2  ;;  %v109_v7 = vld [vmem:[%s206_s2] ss:$0 sm:$0xff]  ;;  %s95_s9 = sshll.u32 %s141_s3, 4  ;;  %s97_s2 = sshll.u32 %s209_s5, 4  ;;  %s96_s9 = int_to_ptr.vmem [resolvable:$true] %s95_s9  ;;  %s98_s2 = int_to_ptr.hbm [resolvable:$true] %s97_s2 }
   0x6   :  { %82 = vmatpush.msra.mxu1 %v59_v4  ;;  %v110_v15 = vld [vmem:[%s208_s4] ss:$0 sm:$0xff] }
   0x8   :  { %83 = vmatpush.msra.mxu1 %v58_v5 }
   0xa   :  { %84 = vmatpush.msra.mxu1 %v57_v6 }
  0x82   :  { %v49_v8 = vpop.f32.mrf.mxu0 }
  0x83   :  { %v50_v9 = vadd.f32 %v109_v7, %v49_v8 }
  0x85   :  { %v52_v10 = vsub.f32 0.0, %v50_v9 }
  0x87   :  { %v53_v11 = vmul.f32 1.442695, %v52_v10 }
  0x89   :  { %111 = vpow2.f32 %v53_v11 }
  0x8f   :  { %v112_v12 = vpop.eup %111 }
  0x90   :  { %v55_v13 = vadd.f32 1.0, %v112_v12 }
  0x92   :  { %113 = vrcp.f32 %v55_v13 }
  0x98   :  { %v114_v14 = vpop.eup %113 }
  0x99   :  { %107 = vmatmul.msk.f32.vlgmr.msra.gmra.mxu1 %vm65_vm1, %v114_v14 }
 0x116   :  { %v86_v16 = vpop.f32.mrf.mxu1 }
 0x117   :  { %v87_v17 = vadd.f32 %v110_v15, %v86_v16 }
 0x119   :  { %89 = vst.msk [vmem:[#allocation2] sm:$0xff] %vm28_vm0, %v87_v17 }
 0x11a   :  { %100 = dma.vmem_to_hbm [thread:$0]  %s96_s9, 128, %s98_s2, [#allocation3]  }
 0x11b   :  { %139 = dma.done.wait [#allocation3], 128  }
 0x11c   :  { %140 = vsyncadd [#allocation3], 4294967168 }
 0x11d   :  { %105 = vsyncpa [#allocation3], 1 }

</bundles_post_ra>
